<compile_context>
chip_gen: v7x
topology: tpu7x:2x2x1
jax: 0.10.0
libtpu: 0.0.40
codegen_flags: <defaults>
</compile_context>

<pallas_src>
import jax
import jax.numpy as jnp
from jax.experimental import pallas as pl
from jax.experimental.pallas import tpu as pltpu

_LANE = 128


# ---------------------------------------------------------------------------
# Kernel 1: XW = x @ W   (hoisted out of the adjacency pipeline)
# ---------------------------------------------------------------------------
def _xw_kernel(x_ref, w_ref, xw_ref):
    # x_ref:  (BT, N, in_dim)   bf16
    # w_ref:  (in_dim, od_pad)  bf16 (zero-padded columns)
    # xw_ref: (BT, N, od_pad)   bf16
    BT, N, in_dim = x_ref.shape
    od = w_ref.shape[1]
    x2d = x_ref[...].reshape(BT * N, in_dim)
    xw = jnp.dot(x2d, w_ref[...], preferred_element_type=jnp.float32)
    xw_ref[...] = xw.reshape(BT, N, od).astype(xw_ref.dtype)


# ---------------------------------------------------------------------------
# Kernel 2: row-tiled AXW + relu + online column sum, finalize mean/softplus
# ---------------------------------------------------------------------------
def _gcn_adj_kernel(xw_ref, adj_ref, o_ref, colsum_ref):
    # xw_ref:     (BT, N, od_pad) bf16  resident across row tiles
    # adj_ref:    (BT, TN, N)     bf16  row tile r
    # o_ref:      (BT, N, od_pad) f32   resident across row tiles
    # colsum_ref: (BT, 1, od_pad) f32   scratch (online column sum of relu)
    r = pl.program_id(1)
    last_r = pl.num_programs(1) - 1

    BT, N, _ = xw_ref.shape
    TN = adj_ref.shape[1]

    @pl.when(r == 0)
    def _init():
        colsum_ref[...] = jnp.zeros_like(colsum_ref)

    # AXW row tile (f32 accumulation on the MXU).
    if BT == 1:
        axw = jnp.dot(adj_ref[0], xw_ref[0],
                      preferred_element_type=jnp.float32)[None]
    else:
        axw = jnp.einsum("btn,bno->bto", adj_ref[...], xw_ref[...],
                         preferred_element_type=jnp.float32)
    relu_tile = jnp.maximum(axw, 0.0)

    # Online column (node-axis) sum — overlaps the XLU reduction with adj DMA.
    colsum_ref[...] += jnp.sum(relu_tile, axis=1, keepdims=True)

    relu_store = relu_tile.astype(o_ref.dtype)
    if TN == N:
        o_ref[...] = relu_store
    else:
        row0 = pl.multiple_of(r * TN, TN)
        o_ref[:, pl.ds(row0, TN), :] = relu_store

    # Finalize once per batch tile: mean over nodes, normalize, softplus.
    @pl.when(r == last_r)
    def _finalize():
        mean = colsum_ref[...] * (1.0 / N) + 1e-6          # (BT, 1, od_pad)
        inv = pl.reciprocal(mean, approx=False)            # exact, tiny array
        y = o_ref[...].astype(jnp.float32)
        o_ref[...] = jax.nn.softplus(y * inv).astype(o_ref.dtype)


# ---------------------------------------------------------------------------
# Tiling / VMEM planning
# ---------------------------------------------------------------------------
def _divisors(n):
    return [d for d in range(1, n + 1) if n % d == 0]


def _vmem_plan():
    """Generation-aware (vmem_limit_bytes, per-step working-set budget)."""
    cap = 64 * 1024 * 1024
    try:
        cap = int(getattr(pltpu.get_tpu_info(), "vmem_capacity_bytes", cap))
    except Exception:
        pass
    # Leave headroom for compiler-internal scratch / spills (critical on v7x,
    # which has 64 MiB per TensorCore; v5e/v6e have 128 MiB).
    limit = min(int(cap * 0.75), cap - 16 * 1024 * 1024)
    limit = max(limit, 32 * 1024 * 1024)
    budget = limit // 2
    return limit, budget


def _pick_adj_tiles(B, N, od_pad, budget_bytes, max_batch_fold):
    """Pick (batch_tile, row_tile) for the adjacency kernel under the budget."""

    def step_bytes(bt, tn):
        adj_blk = bt * tn * N * 2        # bf16
        xw_blk = bt * N * od_pad * 2     # bf16
        o_blk = bt * N * od_pad * 4      # f32
        colsum = bt * od_pad * 4
        return 2 * (adj_blk + xw_blk + o_blk) + colsum   # double-buffered blocks

    # Row tile: whole N if it fits, else the largest multiple-of-8 divisor of N
    # whose block fits (keeps the (8,128) constraint satisfied).
    if step_bytes(1, N) <= budget_bytes:
        tn = N
    else:
        cands = [d for d in _divisors(N) if d % 8 == 0]
        fitting = [d for d in cands if step_bytes(1, d) <= budget_bytes]
        # TODO(synk): for awkward N with no fitting multiple-of-8 divisor, pad N
        #             in the wrapper instead of falling back to an over-budget tile.
        tn = max(fitting) if fitting else (min(cands) if cands else N)

    # Batch fold only when a whole batch fits; capped so the parallel batch grid
    # axis keeps >= 2 steps (v7x has 2 TensorCores per chip).
    bt = 1
    if tn == N:
        for d in _divisors(B):
            if d <= max_batch_fold and step_bytes(d, N) <= budget_bytes:
                bt = d
    return bt, tn


# ---------------------------------------------------------------------------
# pallas_call wrappers
# ---------------------------------------------------------------------------
def _xw_pallas(x_bf, w_pad_bf, budget_bytes, vmem_limit):
    B, N, in_dim = x_bf.shape
    od_pad = w_pad_bf.shape[1]

    def step_bytes(bt):
        return (2 * (bt * N * in_dim * 2 + bt * N * od_pad * 2)
                + in_dim * od_pad * 2)

    bxw = 1
    for d in _divisors(B):
        if step_bytes(d) <= budget_bytes:
            bxw = d

    return pl.pallas_call(
        _xw_kernel,
        out_shape=jax.ShapeDtypeStruct((B, N, od_pad), jnp.bfloat16),
        grid_spec=pltpu.PrefetchScalarGridSpec(
            num_scalar_prefetch=0,
            grid=(B // bxw,),
            in_specs=[
                pl.BlockSpec((bxw, N, in_dim), lambda b: (b, 0, 0)),
                pl.BlockSpec((in_dim, od_pad), lambda b: (0, 0)),
            ],
            out_specs=pl.BlockSpec((bxw, N, od_pad), lambda b: (b, 0, 0)),
        ),
        compiler_params=pltpu.CompilerParams(
            dimension_semantics=("parallel",),
            vmem_limit_bytes=vmem_limit,
        ),
    )(x_bf, w_pad_bf)


def gcn_forward(x, adj, kernel_w):
    B, N, in_dim = x.shape
    out_dim = kernel_w.shape[1]
    assert adj.shape == (B, N, N)
    out_dtype = x.dtype

    vmem_limit, budget = _vmem_plan()

    # Lane-dense padded output width (multiple of 128).
    od_pad = max(_LANE, ((out_dim + _LANE - 1) // _LANE) * _LANE)

    # bf16 MXU operands cast in the wrapper (halves HBM traffic on adj/x/W).
    x_bf = x.astype(jnp.bfloat16)
    adj_bf = adj.astype(jnp.bfloat16)
    w_pad = jnp.zeros((in_dim, od_pad), jnp.bfloat16)
    w_pad = w_pad.at[:, :out_dim].set(kernel_w.astype(jnp.bfloat16))

    # Stage 1: XW (bf16 output, lane-dense padded columns).
    xw_bf = _xw_pallas(x_bf, w_pad, budget, vmem_limit)

    # Stage 2: adjacency matmul + relu + mean-normalize + softplus.
    max_batch_fold = max(1, B // 2) if B >= 2 else 1
    bt, tn = _pick_adj_tiles(B, N, od_pad, budget, max_batch_fold)
    grid = (B // bt, N // tn)

    out_pad = pl.pallas_call(
        _gcn_adj_kernel,
        out_shape=jax.ShapeDtypeStruct((B, N, od_pad), jnp.float32),
        grid_spec=pltpu.PrefetchScalarGridSpec(
            num_scalar_prefetch=0,
            grid=grid,
            in_specs=[
                # XW slab: constant across the row-tile axis (resident).
                pl.BlockSpec((bt, N, od_pad), lambda b, r: (b, 0, 0)),
                # adj: row tile r.
                pl.BlockSpec((bt, tn, N), lambda b, r: (b, r, 0)),
            ],
            # Output resident across the row-tile axis; finalized on the last tile.
            out_specs=pl.BlockSpec((bt, N, od_pad), lambda b, r: (b, 0, 0)),
            scratch_shapes=[pltpu.VMEM((bt, 1, od_pad), jnp.float32)],
        ),
        compiler_params=pltpu.CompilerParams(
            dimension_semantics=("parallel", "arbitrary"),
            vmem_limit_bytes=vmem_limit,
        ),
    )(xw_bf, adj_bf)

    # Slice off the zero-padded columns (they hold softplus(0)=ln2) and cast.
    return out_pad[..., :out_dim].astype(out_dtype)


# ---------------------------------------------------------------------------
# References
# ---------------------------------------------------------------------------
def reference_gcn_f32(x, adj, w):
    """Pure f32 reference, identical to the PyTorch module math."""
    xw = jnp.einsum("bni,io->bno", x, w)
    axw = jnp.einsum("bnm,bmo->bno", adj, xw)
    y = jnp.maximum(axw, 0.0)
    cm = jnp.mean(y, axis=-2, keepdims=True) + 1e-6
    return jax.nn.softplus(y / cm)


def reference_gcn_matched(x, adj, w):
    """Mirrors the kernel's bf16-operand / f32-accumulate arithmetic."""
    xb = x.astype(jnp.bfloat16)
    ab = adj.astype(jnp.bfloat16)
    wb = w.astype(jnp.bfloat16)
    xw = jnp.einsum("bni,io->bno", xb, wb,
                    preferred_element_type=jnp.float32).astype(jnp.bfloat16)
    axw = jnp.einsum("bnm,bmo->bno", ab, xw, preferred_element_type=jnp.float32)
    y = jnp.maximum(axw, 0.0)
    cm = jnp.mean(y, axis=-2, keepdims=True) + 1e-6
    return jax.nn.softplus(y / cm)


if __name__ == "__main__":
    B, N = 2, 16
    in_dim, out_dim = 32, 32

    key = jax.random.PRNGKey(0)
    kx, kadj, kw = jax.random.split(key, 3)

    x = jax.random.normal(kx, (B, N, in_dim), dtype=jnp.float32)
    # symmetric-ish non-negative adjacency, like a normalized graph
    a = jax.random.uniform(kadj, (B, N, N), dtype=jnp.float32)
    adj = 0.5 * (a + jnp.swapaxes(a, -1, -2))

    # Xavier normal init for the GCN kernel: std = sqrt(2 / (in_dim + out_dim))
    std = (2.0 / (in_dim + out_dim)) ** 0.5
    kernel_w = std * jax.random.normal(kw, (in_dim, out_dim), dtype=jnp.float32)

    out = gcn_forward(x, adj, kernel_w)
    jax.block_until_ready(out)
    assert out.shape == (B, N, out_dim)

    ref_matched = reference_gcn_matched(x, adj, kernel_w)
    ref_f32 = reference_gcn_f32(x, adj, kernel_w)

    # tight check vs a reference that uses the same bf16-operand math
    assert jnp.allclose(out, ref_matched, atol=2e-2, rtol=2e-2), \
        "mismatch vs bf16-matched reference"
    # loose sanity check vs the full-f32 reference (bf16 input rounding only)
    assert jnp.allclose(out, ref_f32, atol=1e-1, rtol=1e-1), \
        "mismatch vs f32 reference"

    print("KERNEL_OK")
</pallas_src>

<mosaic_0001>
module attributes {stable_mosaic.version = 11 : i64} {
  func.func @_xw_kernel(%arg0: i32, %arg1: memref<2x16x32xbf16, #tpu.memory_space<vmem>>, %arg2: memref<32x128xbf16, #tpu.memory_space<vmem>>, %arg3: memref<2x16x128xbf16, #tpu.memory_space<vmem>>) attributes {dimension_semantics = [#tpu.dimension_semantics<parallel>], iteration_bounds = array<i64: 1>, scalar_prefetch = 0 : i64, scratch_operands = 0 : i64, tpu.core_type = #tpu.core_type<tc>, window_params = [{transform_indices = @transform_0, window_bounds = array<i64: 2, 16, 32>}, {pipeline_mode = #tpu.pipeline_mode<synchronous>, transform_indices = @transform_1, window_bounds = array<i64: 32, 128>}, {transform_indices = @transform_2, window_bounds = array<i64: 2, 16, 128>}]} {
    %c0 = arith.constant 0 : index
    %c0_0 = arith.constant 0 : index
    %c0_1 = arith.constant 0 : index
    %0 = vector.load %arg1[%c0, %c0_0, %c0_1] : memref<2x16x32xbf16, #tpu.memory_space<vmem>>, vector<2x16x32xbf16>
    %1 = vector.shape_cast %0 : vector<2x16x32xbf16> to vector<32x32xbf16>
    %c0_2 = arith.constant 0 : index
    %c0_3 = arith.constant 0 : index
    %2 = vector.load %arg2[%c0_2, %c0_3] : memref<32x128xbf16, #tpu.memory_space<vmem>>, vector<32x128xbf16>
    %cst = arith.constant dense<0.000000e+00> : vector<32x128xf32>
    %3 = tpu.matmul %1, %2, %cst {dimension_numbers = #tpu.dot_dimension_numbers<[1], [0], [0], [1], [0, 0, 1, 1], [], []>} : vector<32x32xbf16>, vector<32x128xbf16>, vector<32x128xf32> -> vector<32x128xf32>
    %4 = vector.shape_cast %3 : vector<32x128xf32> to vector<2x16x128xf32>
    %5 = arith.truncf %4 : vector<2x16x128xf32> to vector<2x16x128xbf16>
    %c0_4 = arith.constant 0 : index
    %c0_5 = arith.constant 0 : index
    %c0_6 = arith.constant 0 : index
    %6 = vector.load %arg3[%c0_4, %c0_5, %c0_6] : memref<2x16x128xbf16, #tpu.memory_space<vmem>>, vector<2x16x128xbf16>
    tpu.vector_store %arg3[%c0_4, %c0_5, %c0_6], %5 {strides = array<i32>} : memref<2x16x128xbf16, #tpu.memory_space<vmem>>, vector<2x16x128xbf16>,
    return
  }
  func.func @transform_0(%arg0: i32) -> (i32, i32, i32) {
    %c0_i32 = arith.constant 0 : i32
    %c0_i32_0 = arith.constant 0 : i32
    %c0_i32_1 = arith.constant 0 : i32
    return %arg0, %c0_i32, %c0_i32_0 : i32, i32, i32
  }
  func.func @transform_1(%arg0: i32) -> (i32, i32) {
    %c0_i32 = arith.constant 0 : i32
    %c0_i32_0 = arith.constant 0 : i32
    %c0_i32_1 = arith.constant 0 : i32
    return %c0_i32, %c0_i32_0 : i32, i32
  }
  func.func @transform_2(%arg0: i32) -> (i32, i32, i32) {
    %c0_i32 = arith.constant 0 : i32
    %c0_i32_0 = arith.constant 0 : i32
    %c0_i32_1 = arith.constant 0 : i32
    return %arg0, %c0_i32, %c0_i32_0 : i32, i32, i32
  }
}

</mosaic_0001>

<bundles_post_ra>
// kernel: tpu_custom_call.1
= control target key start
LH: loop header
LB: loop body
LE: loop exit
PB: predicated region body
PF: predicated region fallthrough
CT: control target
= control target key end

     0   :  { %7 = vsyncpa [#allocation3], 0  ;;  %s348_s0 = inlined_call_operand.hbm [shape: bf16[2,16,32], index: 0, kind: input, shape index: {}]   ;;  %s349_s1 = inlined_call_operand.hbm [shape: bf16[32,128], index: 1, kind: input, shape index: {}]   ;;  %s350_s2 = inlined_call_operand.hbm [shape: bf16[2,16,128], index: 2, kind: output, shape index: {}]  }
   0x1   :  { %8 = vsyncpa [#allocation6], 0 }
   0x2   :  { %9 = vsyncpa [#allocation4], 0  ;;  %s283_s9 = smov [#allocation2]   ;;  %s211_s13 = scalar_lea.hbm %s348_s0, 256 }
   0x3   :  { %s15_s10 = sshll.u32 %s283_s9, 4  ;;  %p212_p0 = scmp.ne.s32.totalorder %s348_s0, %s211_s13  ;;  %s16_s10 = int_to_ptr.vmem [resolvable:$true] %s15_s10 }
   0x4   :  { %p215_p1 = scmp.lt.u32.totalorder %s211_s13, %s348_s0 }
   0x6   :  { %p217_p2 = pnand %p215_p1, %p212_p0 }
   0x8   :  { %220 = shalt.err (!%p217_p2)
}
   0x9   :  { %s221_s18 = scalar_lea.vmem %s16_s10, 256  ;;  %p226_p4 = scmp.lt.s32.totalorder %s16_s10, %s16_s10 }
   0xa   :  { %p222_p3 = scmp.ne.s32.totalorder %s16_s10, %s221_s18  ;;  %p227_p5 = scmp.lt.s32.totalorder %s221_s18, %s221_s18 }
   0xc   :  { %p228_p6 = por %p227_p5, %p226_p4 }
   0xe   :  { %p229_p7 = pnand %p228_p6, %p222_p3 }
  0x10   :  { %232 = shalt.err (!%p229_p7)
}
  0x11   :  { %s284_s19 = smov 64   ;;  %s285_s20 = smov 4  }
  0x12   :  { %21 = dma.hbm_to_vmem [thread:$0]  %s348_s0, 256, %s16_s10, [#allocation3], %s284_s19, %s284_s19, %s285_s20  }
  0x13   :  { %s286_s23 = smov [#allocation5]   ;;  %s233_s27 = scalar_lea.hbm %s349_s1, 256 }
  0x14   :  { %s27_s24 = sshll.u32 %s286_s23, 4  ;;  %p234_p8 = scmp.ne.s32.totalorder %s349_s1, %s233_s27  ;;  %s28_s24 = int_to_ptr.vmem [resolvable:$true] %s27_s24 }
  0x15   :  { %p237_p9 = scmp.lt.u32.totalorder %s233_s27, %s349_s1 }
  0x17   :  { %p239_p10 = pnand %p237_p9, %p234_p8 }
  0x19   :  { %242 = shalt.err (!%p239_p10)
}
  0x1a   :  { %s243_s4 = scalar_lea.vmem %s28_s24, 256  ;;  %p248_p12 = scmp.lt.s32.totalorder %s28_s24, %s28_s24 }
  0x1b   :  { %p244_p11 = scmp.ne.s32.totalorder %s28_s24, %s243_s4  ;;  %p249_p13 = scmp.lt.s32.totalorder %s243_s4, %s243_s4 }
  0x1d   :  { %p250_p0 = por %p249_p13, %p248_p12 }
  0x1f   :  { %p251_p1 = pnand %p250_p0, %p244_p11 }
  0x21   :  { %254 = shalt.err (!%p251_p1)
}
  0x22   :  { %33 = dma.hbm_to_vmem [thread:$0]  %s349_s1, 256, %s28_s24, [#allocation6], %s284_s19, %s284_s19, %s285_s20  }
  0x23   :  { %277 = dma.done.wait [#allocation3], 256  }
  0x24   :  { %278 = vsyncadd [#allocation3], 4294967040 }
  0x25   :  { %279 = dma.done.wait [#allocation6], 256  }
  0x26   :  { %280 = vsyncadd [#allocation6], 4294967040  ;;  %v207_v0 = vld [vmem:[#allocation5] sm:$0xff]   ;;  %v208_v1 = vld [vmem:[#allocation5 + $0x8] sm:$0xff]   ;;  %vm71_vm0 = vcmask 261120   ;;  %s287_s6 = smov [#allocation7]  }
  0x27   :  { %194 = vmatprep.subr.bf16.mxu0 %v207_v0  ;;  %v209_v2 = vld [vmem:[#allocation2] sm:$0xff]   ;;  %v210_v3 = vld [vmem:[#allocation2 + $0x8] sm:$0xff]   ;;  %s152_s7 = sshll.u32 %s287_s6, 4  ;;  %s153_s7 = int_to_ptr.vmem [resolvable:$true] %s152_s7 }
  0x28   :  { %195 = vmatpush3.bf16.msra.mxu0 %v207_v0  ;;  %198 = vmatprep.mubr.msk.bf16.mxu0 %vm71_vm0, %v209_v2  ;;  %s255_s1 = scalar_lea.vmem %s153_s7, 256  ;;  %p260_p3 = scmp.lt.s32.totalorder %s153_s7, %s153_s7 }
  0x29   :  { %196 = vmatprep.subr.bf16.mxu0 %v208_v1  ;;  %p256_p2 = scmp.ne.s32.totalorder %s153_s7, %s255_s1  ;;  %p261_p4 = scmp.lt.s32.totalorder %s255_s1, %s255_s1 }
  0x2b   :  { %p262_p5 = por %p261_p4, %p260_p3 }
  0x2c   :  { %197 = vmatpush3.bf16.msra.mxu0 %v208_v1 }
  0x2d   :  { %p263_p6 = pnand %p262_p5, %p256_p2 }
  0x2f   :  { %199 = vmatmul.mubr.msk.bf16.vlgmr.msra.gmra.mrb[0].mxu0 %vm71_vm0, %v210_v3 }
 0x102   :  { %v200_v4 = vpop.f32.mrb[0].mxu0 }
 0x103   :  { %v112_v5 = vpop.f32.mrb[1].mxu0 }
 0x104   :  { %v201_v6 = vpop.f32.mrb[2].mxu0 }
 0x105   :  { %v187_v7 = vpack.c.bf16 %v201_v6, %v200_v4  ;;  %v115_v8 = vpop.f32.mrb[3].mxu0 }
 0x106   :  { %v182_v9 = vpack.c.bf16 %v115_v8, %v112_v5 }
 0x107   :  { %189 = vst [vmem:[#allocation7 + $0x8] sm:$0xff] %v187_v7  }
 0x108   :  { %183 = vst [vmem:[#allocation7] sm:$0xff] %v182_v9  }
 0x109   :  { %266 = shalt.err (!%p263_p6)
}
 0x10a   :  { %s267_s10 = scalar_lea.hbm %s350_s2, 256 }
 0x10b   :  { %p268_p7 = scmp.ne.s32.totalorder %s350_s2, %s267_s10  ;;  %p271_p8 = scmp.lt.u32.totalorder %s267_s10, %s350_s2 }
 0x10d   :  { %p273_p9 = pnand %p271_p8, %p268_p7 }
 0x10f   :  { %276 = shalt.err (!%p273_p9)
}
 0x110   :  { %158 = dma.vmem_to_hbm [thread:$0]  %s153_s7, 256, %s350_s2, [#allocation4], %s284_s19, %s284_s19, %s285_s20  }
 0x111   :  { %281 = dma.done.wait [#allocation4], 256  }
 0x112   :  { %282 = vsyncadd [#allocation4], 4294967040 }
 0x113   :  { %162 = vsyncpa [#allocation3], 1 }
 0x114   :  { %163 = vsyncpa [#allocation6], 1 }
 0x115   :  { %164 = vsyncpa [#allocation4], 1 }

</bundles_post_ra>
